<compile_context>
chip_gen: v5e
topology: v5e:2x2
jax: 0.10.0
libtpu: 0.0.40
codegen_flags: <defaults>
</compile_context>

<pallas_src>
import functools

import jax
import jax.numpy as jnp
from jax.experimental import pallas as pl
from jax.experimental.pallas import tpu as pltpu


def _pool_kernel(x_ref, sum_ref, *, inv_hw):
    """Global-average-pool accumulation over HW tiles.

    x_ref:   (C, T)  one HW tile of one batch element (native dtype)
    sum_ref: (C, 1)  f32 accumulator, resident across the HW grid axis
    """
    t = pl.program_id(1)

    @pl.when(t == 0)
    def _init():
        sum_ref[...] = jnp.zeros_like(sum_ref)

    sum_ref[...] += jnp.sum(x_ref[...].astype(jnp.float32), axis=1, keepdims=True)

    @pl.when(t == pl.num_programs(1) - 1)
    def _finalize():
        sum_ref[...] = sum_ref[...] * inv_hw


def _gate_kernel(x_ref, chn_ref, ws_ref, o_ref):
    """Fused spatial-SE + gating for one (C, T) tile.

    x_ref:   (C, T)  input tile (native dtype)
    chn_ref: (C, 1)  precomputed channel gate (f32, already sigmoid'ed)
    ws_ref:  (C, 1)  1x1 spatial-SE conv weight (f32)
    o_ref:   (C, T)  output tile
    """
    x = x_ref[...]                                              # native dtype

    # Spatial SE: per-pixel weighted sum over channels (VPU mul + sublane
    # reduce; no degenerate M=1 matmul through the MXU).
    spa = jnp.sum(x.astype(jnp.float32) * ws_ref[...], axis=0, keepdims=True)  # (1, T)
    spa_gate = jax.nn.sigmoid(spa)                              # (1, T)

    chn_gate = chn_ref[...]                                     # (C, 1)

    # Final gating in the input dtype; only the small gate vectors are cast.
    o_ref[...] = (x * chn_gate.astype(x.dtype) * spa_gate.astype(x.dtype)
                  ).astype(o_ref.dtype)


def _pick_hw_tile(hw, c, itemsize, target_bytes=2 * 1024 * 1024):
    """Largest multiple-of-128 divisor of hw whose (C, T) tile fits target."""
    candidates = [t for t in (4096, 2048, 1024, 512, 256, 128) if hw % t == 0]
    for t in candidates:
        if c * t * itemsize <= target_bytes:
            return t
    if candidates:                       # everything too big -> smallest divisor
        return candidates[-1]
    return hw                            # hw not a multiple of 128: full block


def modified_scse_block(x_nchw, w1, b1, w2, b2, w_spatial, *, hw_tile=None):
    """ModifiedSCSEBlock forward.

    x_nchw:    (B, C, H, W)
    w1:        (C, Cr)   Linear(channel, channel//r).weight.T
    b1:        (1, Cr)
    w2:        (Cr, C)   Linear(channel//r, channel).weight.T
    b2:        (1, C)
    w_spatial: (C, 1)    Conv2d(channel, 1, 1, bias=False).weight reshaped
    """
    B, C, H, W = x_nchw.shape
    HW = H * W
    x = x_nchw.reshape(B, C, HW)                     # free reshape, no transpose
    itemsize = x.dtype.itemsize

    if hw_tile is None:
        hw_tile = _pick_hw_tile(HW, C, itemsize)
    assert HW % hw_tile == 0, "hw_tile must divide H*W"
    n_t = HW // hw_tile

    block_bytes = C * hw_tile * itemsize
    # Explicit scoped-VMEM budget (covers double-buffered in+out blocks), kept
    # well under v7x's 64 MiB physical VMEM.
    vmem_limit = int(min(48 * 2**20, max(32 * 2**20, 8 * block_bytes)))

    # ---- pass 1: global average pool over HW (Pallas reduce) ----------------
    pooled = pl.pallas_call(
        functools.partial(_pool_kernel, inv_hw=float(1.0 / HW)),
        out_shape=jax.ShapeDtypeStruct((B, C, 1), jnp.float32),
        grid_spec=pltpu.PrefetchScalarGridSpec(
            num_scalar_prefetch=0,
            grid=(B, n_t),
            in_specs=[pl.BlockSpec((None, C, hw_tile), lambda b, t: (b, 0, t))],
            out_specs=pl.BlockSpec((None, C, 1), lambda b, t: (b, 0, 0)),
        ),
        compiler_params=pltpu.CompilerParams(
            dimension_semantics=("parallel", "arbitrary"),
            vmem_limit_bytes=vmem_limit),
        cost_estimate=pl.CostEstimate(
            flops=B * C * HW,
            transcendentals=0,
            bytes_accessed=B * C * HW * itemsize + B * C * 4),
    )(x)

    # ---- channel excitation MLP (tiny, O(B*C*Cr)): plain JAX ----------------
    p = pooled[:, :, 0]                                                  # (B, C) f32
    h = jnp.maximum(p @ w1.astype(jnp.float32) + b1.astype(jnp.float32), 0.0)
    chn = jax.nn.sigmoid(h @ w2.astype(jnp.float32) + b2.astype(jnp.float32))
    chn_gate = chn[:, :, None].astype(jnp.float32)                       # (B, C, 1)

    # ---- pass 2: fused spatial-SE + gating, tiled over (B, HW) --------------
    out = pl.pallas_call(
        _gate_kernel,
        out_shape=jax.ShapeDtypeStruct((B, C, HW), x_nchw.dtype),
        grid_spec=pltpu.PrefetchScalarGridSpec(
            num_scalar_prefetch=0,
            grid=(B, n_t),
            in_specs=[
                pl.BlockSpec((None, C, hw_tile), lambda b, t: (b, 0, t)),  # x
                pl.BlockSpec((None, C, 1), lambda b, t: (b, 0, 0)),        # chn gate
                pl.BlockSpec((C, 1), lambda b, t: (0, 0)),                 # ws
            ],
            out_specs=pl.BlockSpec((None, C, hw_tile), lambda b, t: (b, 0, t)),
        ),
        compiler_params=pltpu.CompilerParams(
            dimension_semantics=("parallel", "parallel"),
            vmem_limit_bytes=vmem_limit),
        cost_estimate=pl.CostEstimate(
            flops=5 * B * C * HW,
            transcendentals=B * HW,
            bytes_accessed=2 * B * C * HW * itemsize + B * C * 4 + C * 4),
    )(x, chn_gate, w_spatial.astype(jnp.float32))

    return out.reshape(B, C, H, W)


def _reference(x_nchw, w1, b1, w2, b2, w_spatial):
    """Plain-JAX reference mirroring the PyTorch forward."""
    pooled = jnp.mean(x_nchw, axis=(2, 3))                      # (B, C)
    h = jnp.maximum(pooled @ w1 + b1, 0.0)                      # (B, Cr)
    chn = jax.nn.sigmoid(h @ w2 + b2)[:, :, None, None]         # (B, C, 1, 1)
    spa = jnp.einsum("bchw,c->bhw", x_nchw, w_spatial[:, 0])    # (B, H, W)
    spa = jax.nn.sigmoid(spa)[:, None, :, :]                    # (B, 1, H, W)
    return x_nchw * chn * spa


if __name__ == "__main__":
    # Small shapes consistent with the module: reduction=16 => channel >= 16.
    B, C, H, W = 2, 32, 16, 16
    reduction = 16
    Cr = C // reduction  # 2

    key = jax.random.PRNGKey(0)
    kx, k1, kb1, k2, kb2, ks = jax.random.split(key, 6)

    x = jax.random.normal(kx, (B, C, H, W), dtype=jnp.float32)

    # Deterministic synthetic parameters (shapes from nn.Linear / nn.Conv2d).
    w1 = jax.random.normal(k1, (C, Cr), dtype=jnp.float32) * 0.1   # Linear(C, C//r).weight^T
    b1 = jax.random.normal(kb1, (1, Cr), dtype=jnp.float32) * 0.1
    w2 = jax.random.normal(k2, (Cr, C), dtype=jnp.float32) * 0.1   # Linear(C//r, C).weight^T
    b2 = jax.random.normal(kb2, (1, C), dtype=jnp.float32) * 0.1
    w_spatial = jax.random.normal(ks, (C, 1), dtype=jnp.float32) * 0.1  # Conv2d(C,1,1).weight

    # hw_tile=128 exercises the multi-tile (accumulating) path on HW=256.
    out = modified_scse_block(x, w1, b1, w2, b2, w_spatial, hw_tile=128)
    out = jax.block_until_ready(out)

    ref = _reference(x, w1, b1, w2, b2, w_spatial)
    assert out.shape == (B, C, H, W)
    assert jnp.allclose(out, ref, atol=1e-5, rtol=1e-5), "mismatch vs reference"

    print("KERNEL_OK")
</pallas_src>

<mosaic_0001>
module attributes {stable_mosaic.version = 11 : i64} {
  func.func @_pool_kernel(%arg0: i32, %arg1: i32, %arg2: memref<1x32x128xf32, #tpu.memory_space<vmem>>, %arg3: memref<1x32x1xf32, #tpu.memory_space<vmem>>) attributes {dimension_semantics = [#tpu.dimension_semantics<parallel>, #tpu.dimension_semantics<arbitrary>], iteration_bounds = array<i64: 2, 2>, scalar_prefetch = 0 : i64, scratch_operands = 0 : i64, tpu.core_type = #tpu.core_type<tc>, window_params = [{transform_indices = @transform_0, window_bounds = array<i64: 1, 32, 128>}, {transform_indices = @transform_1, window_bounds = array<i64: 1, 32, 1>}]} {
    %c0_i32 = arith.constant 0 : i32
    %0 = arith.cmpi eq, %arg1, %c0_i32 : i32
    %1 = arith.extui %0 : i1 to i32
    %c0_i32_0 = arith.constant 0 : i32
    %2 = arith.cmpi ne, %1, %c0_i32_0 : i32
    scf.if %2 {
      %cst_10 = arith.constant 0.000000e+00 : f32
      %16 = vector.broadcast %cst_10 : f32 to vector<32x1xf32>
      %c0_11 = arith.constant 0 : index
      %c0_12 = arith.constant 0 : index
      %c0_13 = arith.constant 0 : index
      %17 = vector.load %arg3[%c0_11, %c0_12, %c0_13] : memref<1x32x1xf32, #tpu.memory_space<vmem>>, vector<1x32x1xf32>
      %18 = vector.shape_cast %17 : vector<1x32x1xf32> to vector<32x1xf32>
      %19 = vector.shape_cast %16 : vector<32x1xf32> to vector<1x32x1xf32>
      tpu.vector_store %arg3[%c0_11, %c0_12, %c0_13], %19 {strides = array<i32>} : memref<1x32x1xf32, #tpu.memory_space<vmem>>, vector<1x32x1xf32>,
    } else {
    }
    %c0 = arith.constant 0 : index
    %c0_1 = arith.constant 0 : index
    %c0_2 = arith.constant 0 : index
    %3 = vector.load %arg3[%c0, %c0_1, %c0_2] : memref<1x32x1xf32, #tpu.memory_space<vmem>>, vector<1x32x1xf32>
    %4 = vector.shape_cast %3 : vector<1x32x1xf32> to vector<32x1xf32>
    %c0_3 = arith.constant 0 : index
    %c0_4 = arith.constant 0 : index
    %c0_5 = arith.constant 0 : index
    %5 = vector.load %arg2[%c0_3, %c0_4, %c0_5] : memref<1x32x128xf32, #tpu.memory_space<vmem>>, vector<1x32x128xf32>
    %6 = vector.shape_cast %5 : vector<1x32x128xf32> to vector<32x128xf32>
    %cst = arith.constant dense<0.000000e+00> : vector<32xf32>
    %7 = vector.multi_reduction <add>, %6, %cst [1] : vector<32x128xf32> to vector<32xf32>
    %8 = vector.shape_cast %7 : vector<32xf32> to vector<32x1xf32>
    %9 = arith.addf %4, %8 : vector<32x1xf32>
    %c0_6 = arith.constant 0 : index
    %c0_7 = arith.constant 0 : index
    %c0_8 = arith.constant 0 : index
    %10 = vector.load %arg3[%c0_6, %c0_7, %c0_8] : memref<1x32x1xf32, #tpu.memory_space<vmem>>, vector<1x32x1xf32>
    %11 = vector.shape_cast %10 : vector<1x32x1xf32> to vector<32x1xf32>
    %12 = vector.shape_cast %9 : vector<32x1xf32> to vector<1x32x1xf32>
    tpu.vector_store %arg3[%c0_6, %c0_7, %c0_8], %12 {strides = array<i32>} : memref<1x32x1xf32, #tpu.memory_space<vmem>>, vector<1x32x1xf32>,
    %c1_i32 = arith.constant 1 : i32
    %13 = arith.cmpi eq, %arg1, %c1_i32 : i32
    %14 = arith.extui %13 : i1 to i32
    %c0_i32_9 = arith.constant 0 : i32
    %15 = arith.cmpi ne, %14, %c0_i32_9 : i32
    scf.if %15 {
      %c0_10 = arith.constant 0 : index
      %c0_11 = arith.constant 0 : index
      %c0_12 = arith.constant 0 : index
      %16 = vector.load %arg3[%c0_10, %c0_11, %c0_12] : memref<1x32x1xf32, #tpu.memory_space<vmem>>, vector<1x32x1xf32>
      %17 = vector.shape_cast %16 : vector<1x32x1xf32> to vector<32x1xf32>
      %cst_13 = arith.constant 3.906250e-03 : f32
      %18 = vector.broadcast %cst_13 : f32 to vector<32x1xf32>
      %19 = arith.mulf %17, %18 : vector<32x1xf32>
      %c0_14 = arith.constant 0 : index
      %c0_15 = arith.constant 0 : index
      %c0_16 = arith.constant 0 : index
      %20 = vector.load %arg3[%c0_14, %c0_15, %c0_16] : memref<1x32x1xf32, #tpu.memory_space<vmem>>, vector<1x32x1xf32>
      %21 = vector.shape_cast %20 : vector<1x32x1xf32> to vector<32x1xf32>
      %22 = vector.shape_cast %19 : vector<32x1xf32> to vector<1x32x1xf32>
      tpu.vector_store %arg3[%c0_14, %c0_15, %c0_16], %22 {strides = array<i32>} : memref<1x32x1xf32, #tpu.memory_space<vmem>>, vector<1x32x1xf32>,
    } else {
    }
    return
  }
  func.func @transform_0(%arg0: i32, %arg1: i32) -> (i32, i32, i32) {
    %c0_i32 = arith.constant 0 : i32
    %c0_i32_0 = arith.constant 0 : i32
    return %arg0, %c0_i32, %arg1 : i32, i32, i32
  }
  func.func @transform_1(%arg0: i32, %arg1: i32) -> (i32, i32, i32) {
    %c0_i32 = arith.constant 0 : i32
    %c0_i32_0 = arith.constant 0 : i32
    %c0_i32_1 = arith.constant 0 : i32
    return %arg0, %c0_i32, %c0_i32_0 : i32, i32, i32
  }
}

</mosaic_0001>

<bundles_post_ra>
// kernel: tpu_custom_call.1
= control target key start
LH: loop header
LB: loop body
LE: loop exit
PB: predicated region body
PF: predicated region fallthrough
CT: control target
= control target key end

     0   :  { %6 = vsyncpa [#allocation3], 0  ;;  %s632_s0 = inlined_call_operand.hbm [shape: f32[2,32,256], index: 0, kind: input, shape index: {}]   ;;  %s633_s1 = inlined_call_operand.vmem [shape: f32[2,32,1], index: 1, kind: output, shape index: {}]  }
   0x1   :  { %8 = vsyncpa [#allocation3 + $0x1], 0  ;;  %s487_s6 = smov 0   ;;  %s489_s7 = smov 0  }
   0x2   :  { %s491_s8 = smov 0   ;;  %s493_s9 = smov 0  }
   0x3   :  { %s495_s10 = smov 0   ;;  %s497_s11 = smov 0  }
   0x4   :  { %s499_s12 = smov 0   ;;  %s501_s13 = smov 0  }
   0x5 LB: > { %s284_s14 = sadd.s32 4294967295, %s471_s13   ;;  %s23_s15 = sadd.s32 1, %s463_s11  ;;  %s471_s13 = sphi %s501_s13, %s14_s13   ;;  %s467_s12 = sphi %s499_s12, %s642_s12   ;;  %s463_s11 = sphi %s497_s11, %s641_s11   ;;  %s459_s10 = sphi %s495_s10, %s640_s10   ;;  %s455_s9 = sphi %s493_s9, %s639_s9   ;;  %s451_s8 = sphi %s491_s8, %s638_s8   ;;  %s447_s7 = sphi %s489_s7, %s637_s7   ;;  %s443_s6 = sphi %s487_s6, %s636_s6  }
   0x6   : > { %p24_p0 = scmp.ge.s32.totalorder %s23_s15, 2  ;;  %s26_s16 = sadd.s32 1, %s467_s12 }
   0x7   : > { %s35_s17 = sadd.s32 1, %s451_s8  ;;  %p42_p1 = scmp.ne.s32.totalorder %s451_s8, %s447_s7 }
   0x8   : > { %s644_s15 = smov (%p24_p0, %s23_s15), 0  ;;  %s646_s16 = smov (!%p24_p0, %s26_s16), %s467_s12 }
   0x9   : > { %s31_s18 = ssub.s32 %s463_s11, %s644_s15  ;;  %p43_p2 = scmp.eq.s32.totalorder %s471_s13, 0 }
   0xa   : > { %p28_p3 = scmp.ge.s32.totalorder %s646_s16, 2  ;;  %p48_p4 = scmp.ne.s32.totalorder %s447_s7, %s443_s6 }
   0xb   : > { %p538_p5 = por %p43_p2, %p42_p1  ;;  %p49_p6 = scmp.eq.s32.totalorder %s284_s14, 0 }
   0xc   : > { %s648_s16 = smov (%p28_p3, %s646_s16), 0  ;;  %p306_p8 = scmp.lt.s32.totalorder %s471_s13, 4 }
   0xd   : > { %p544_p7 = por %p49_p6, %p48_p4  ;;  %s30_s21 = ssub.s32 %s467_s12, %s648_s16 }
   0xe   : > { %s32_s22 = sor.u32 %s31_s18, %s30_s21  ;;  %s98_s23 = sand.u32 1, %s451_s8  }
   0xf   : > { %p33_p9 = scmp.eq.s32.totalorder %s32_s22, 0  ;;  %s288_s24 = sshll.u32 %s98_s23, 5 }
  0x10   : > { %s289_s25 = sshll.u32 %s467_s12, 3  ;;  %s102_s29 = scalar_lea.vmem [#allocation2], %s288_s24 }
  0x11   : > { %s554_s26 = scalar_select %p33_p9, %s451_s8, %s35_s17  }
  0x12   : > { %s106_s27 = sadd.s32 %s463_s11, %s289_s25  ;;  %s111_s30 = sshll.u32 %s102_s29, 4  ;;  %s112_s30 = int_to_ptr.vmem [resolvable:$true] %s111_s30 }
  0x13   : > { %s290_s28 = sshll.u32 %s106_s27, 3  ;;  %p303_p10 = pnand %p306_p8, %p538_p5 }
  0x14   : > { %s108_s4 = scalar_lea.hbm %s632_s0, %s290_s28  ;;  %p291_p11 = scmp.ge.s32.totalorder %s471_s13, 1 }
  0x15   : > { %s109_s5 = sshll.u32 %s108_s4, 4  ;;  %s99_s6 = scalar_lea.sflag [#allocation3], %s98_s23  ;;  %s110_s5 = int_to_ptr.hbm [resolvable:$true] %s109_s5 }
  0x16   : > { %s473_s14 = smov 256   ;;  %s474_s17 = smov 128  }
  0x17   : > { %s475_s18 = smov 8   ;;  %p119_p12 = scmp.lt.s32.totalorder %s471_s13, 5 }
  0x18   : > { %305 = dma.hbm_to_vmem [thread:$0]  (!%p303_p10), %s110_s5, 512, %s112_s30, %s99_s6, %s473_s14, %s474_s17, %s475_s18  }
  0x19   : > { %p120_p13 = pnand %p291_p11, %p119_p12 }
  0x1a   : > { %s125_s21 = sand.u32 (!%p120_p13), 1, %s447_s7  }
  0x1b   : > { %123 = sbr.rel (%p120_p13) target bundleno = 184 (0xb8), region = 24  ;;  %s292_s22 = sshll.u32 (!%p120_p13), %s125_s21, 5 }
  0x1c   : > { %s126_s24 = scalar_lea.sflag (!%p120_p13), [#allocation3], %s125_s21  ;;  %s129_s25 = scalar_lea.vmem (!%p120_p13), [#allocation2], %s292_s22 }
  0x20   : > { %438 = dma.done.wait (%p544_p7), %s126_s24, 512  }
  0x21   : > { %440 = vsyncadd (%p544_p7), %s126_s24, 4294966784  ;;  %p149_p0 = scmp.lt.s32.totalorder %s459_s10, 1  ;;  %p295_p1 = scmp.ne.s32.totalorder %s455_s9, 0 }
  0x23   : > { %s650_s10 = smov (!%p149_p0, %s459_s10), 1  ;;  %157 = sbr.rel (%p295_p1) target bundleno = 45 (0x2d), region = 32 }
  0x24   : > { %s299_s19 = sshll.u32 %s650_s10, 5 }
  0x25   : > { %s576_s28 = scalar_lea.vmem %s633_s1, %s299_s19 }
  0x28   : > { %vm158_vm0 = vcmask 7168   ;;  %v476_v0 = vmov 0.0  }
  0x29   : > { %159 = vst.msk [vmem:[%s576_s28] sm:$0xff] %vm158_vm0, %v476_v0 }
  0x2a   : > { %160 = vst.msk [vmem:[%s576_s28 + $0x8] sm:$0xff] %vm158_vm0, %v476_v0 }
  0x2b   : > { %161 = vst.msk [vmem:[%s576_s28 + $0x10] sm:$0xff] %vm158_vm0, %v476_v0 }
  0x2c   : > { %162 = vst.msk [vmem:[%s576_s28 + $0x18] sm:$0xff] %vm158_vm0, %v476_v0 }
  0x2d PF: > { %v169_v1 = vld [vmem:[%s129_s25 + $0x10] sm:$0xff]  ;;  %v167_v2 = vld [vmem:[%s129_s25] sm:$0xff]  ;;  %v170_v3 = vld [vmem:[%s129_s25 + $0x18] sm:$0xff]  ;;  %vm183_vm1 = vcmask 7168   ;;  %p296_p2 = scmp.ne.s32.totalorder %s455_s9, 1 }
  0x2e   : > { %175 = vadd.xlane.f32.xlu1 %v169_v1  ;;  %171 = vadd.xlane.f32.xlu0 %v167_v2  ;;  %v168_v4 = vld [vmem:[%s129_s25 + $0x8] sm:$0xff] }
  0x30   : > { %v163_v6 = vld [vmem:[%s576_s28] sm:$0xff] }
  0x31   : > { %v164_v12 = vld [vmem:[%s576_s28 + $0x8] sm:$0xff] }
  0x32   : > { %v165_v5 = vld [vmem:[%s576_s28 + $0x10] sm:$0xff] }
  0x33   : > { %v166_v11 = vld [vmem:[%s576_s28 + $0x18] sm:$0xff] }
  0x36   : > { %177 = vadd.xlane.f32.xlu1 %v170_v3  ;;  %173 = vadd.xlane.f32.xlu0 %v168_v4 }
  0xa1   : > { %v176_v7 = vpop.xlane.xlu1 %175  ;;  %v172_v8 = vpop.xlane.xlu0 %171 }
  0xa2   : > { %v181_v9 = vadd.f32 %v176_v7, %v165_v5  ;;  %v179_v10 = vadd.f32 %v172_v8, %v163_v6 }
  0xa4   : > { %186 = vst.msk [vmem:[%s576_s28 + $0x10] sm:$0xff] %vm183_vm1, %v181_v9 }
  0xa5   : > { %184 = vst.msk [vmem:[%s576_s28] sm:$0xff] %vm183_vm1, %v179_v10 }
  0xa9   : > { %v178_v13 = vpop.xlane.xlu1 %177  ;;  %v174_v14 = vpop.xlane.xlu0 %173  ;;  %191 = sbr.rel (%p296_p2) target bundleno = 184 (0xb8), region = 36 }
  0xaa   : > { %v182_v15 = vadd.f32 %v178_v13, %v166_v11  ;;  %v180_v16 = vadd.f32 %v174_v14, %v164_v12 }
  0xac   : > { %187 = vst.msk [vmem:[%s576_s28 + $0x18] sm:$0xff] %vm183_vm1, %v182_v15 }
  0xad   : > { %185 = vst.msk [vmem:[%s576_s28 + $0x8] sm:$0xff] %vm183_vm1, %v180_v16 }
  0xae   : > { %v192_v17 = vld [vmem:[%s576_s28] sm:$0xff]  ;;  %v194_v19 = vld [vmem:[%s576_s28 + $0x10] sm:$0xff] }
  0xaf   : > { %v196_v20 = vmul.f32 0.00390625, %v192_v17  ;;  %v198_v22 = vmul.f32 0.00390625, %v194_v19 }
  0xb1   : > { %200 = vst.msk [vmem:[%s576_s28] sm:$0xff] %vm183_vm1, %v196_v20 }
  0xb2   : > { %202 = vst.msk [vmem:[%s576_s28 + $0x10] sm:$0xff] %vm183_vm1, %v198_v22 }
  0xb3   : > { %v195_v23 = vld [vmem:[%s576_s28 + $0x18] sm:$0xff] }
  0xb4   : > { %v193_v18 = vld [vmem:[%s576_s28 + $0x8] sm:$0xff]  ;;  %v199_v24 = vmul.f32 0.00390625, %v195_v23 }
  0xb5   : > { %v197_v21 = vmul.f32 0.00390625, %v193_v18 }
  0xb6   : > { %203 = vst.msk [vmem:[%s576_s28 + $0x18] sm:$0xff] %vm183_vm1, %v199_v24 }
  0xb7   : > { %201 = vst.msk [vmem:[%s576_s28 + $0x8] sm:$0xff] %vm183_vm1, %v197_v21 }
  0xb8 PF: > { %s14_s13 = sadd.s32 1, %s471_s13   ;;  %s636_s6 = smov %s447_s7 }
  0xb9   : > { %p11_p3 = scmp.ge.s32.totalorder %s14_s13, 6   ;;  %s637_s7 = smov %s451_s8 }
  0xba   : > { %s638_s8 = smov %s554_s26  ;;  %s639_s9 = smov %s463_s11 }
  0xbb   : > { %s640_s10 = smov %s467_s12  ;;  %s641_s11 = smov %s644_s15 }
  0xbc   : > { %s642_s12 = smov %s648_s16  ;;  %13 = sbr.rel (!%p11_p3) target bundleno = 5 (0x5), region = 72 }
  0xc1   :  { %225 = vsyncpa [#allocation3], 1 }
  0xc2   :  { %227 = vsyncpa [#allocation3 + $0x1], 1 }

</bundles_post_ra>
